<compile_context>
chip_gen: v7x
topology: tpu7x:2x2x1
jax: 0.10.0
libtpu: 0.0.40
codegen_flags: <defaults>
</compile_context>

<pallas_src>
import jax
import jax.numpy as jnp
from jax.experimental import pallas as pl
from jax.experimental.pallas import tpu as pltpu


def _round_up(x, m):
    return ((x + m - 1) // m) * m


def _make_l2loss_kernel(bn, r, Ho, Wo, Hd, Wd, n_total):
    """Kernel over one batch block: out (bn,Ho,Wo), den (bn,Hd,Wd) -> (1,1,1)."""
    needs_mask = (n_total % bn) != 0

    def kernel(out_ref, den_ref, psum_ref):
        if r > 1:
            # 0/1 block-sum pooling matrices built in-kernel (VPU iota+compare).
            # ph[p, h] = 1 iff p*r <= h < (p+1)*r   -> (Ho, Hd)
            # pw[w, q] = 1 iff q*r <= w < (q+1)*r   -> (Wd, Wo)
            row_h = jax.lax.broadcasted_iota(jnp.int32, (Ho, Hd), 0)
            col_h = jax.lax.broadcasted_iota(jnp.int32, (Ho, Hd), 1)
            ph = ((col_h >= row_h * r) & (col_h < (row_h + 1) * r)).astype(jnp.float32)
            row_w = jax.lax.broadcasted_iota(jnp.int32, (Wd, Wo), 0)
            col_w = jax.lax.broadcasted_iota(jnp.int32, (Wd, Wo), 1)
            pw = ((row_w >= col_w * r) & (row_w < (col_w + 1) * r)).astype(jnp.float32)

        if needs_mask:
            base = pl.program_id(0) * bn

        def body(i, acc):
            o = out_ref[i].astype(jnp.float32)   # (Ho, Wo), cast in-kernel
            d = den_ref[i].astype(jnp.float32)   # (Hd, Wd), cast in-kernel
            if r > 1:
                hp = jnp.dot(ph, d, preferred_element_type=jnp.float32)       # (Ho, Wd)
                pooled = jnp.dot(hp, pw, preferred_element_type=jnp.float32)  # (Ho, Wo)
            else:
                pooled = d
            diff = o - pooled
            sq = diff * diff
            if needs_mask:
                # Ragged tail: images past n_total come from the partial last
                # block; use a select (not a multiply) so garbage NaN/Inf is
                # dropped cleanly.
                sq = jnp.where(base + i < n_total, sq, jnp.zeros_like(sq))
            return acc + sq                       # elementwise VALU accumulate

        acc0 = jnp.zeros((Ho, Wo), jnp.float32)
        if bn <= 8:
            acc = acc0
            for i in range(bn):                   # full static unroll, static indices
                acc = body(i, acc)
        else:
            acc = jax.lax.fori_loop(0, bn, body, acc0, unroll=8)

        # Single cross-lane/sublane reduction per grid block.
        psum_ref[...] = jnp.reshape(jnp.sum(acc), (1, 1, 1))

    return kernel


def l2_loss(outputs_density_map, density_map, downsample_ratio):
    """outputs_density_map: (N, 1, Ho, Wo); density_map: (N, 1, Ho*r, Wo*r)."""
    r = int(downsample_ratio)
    N, C, Ho, Wo = outputs_density_map.shape
    Nd, Cd, Hd, Wd = density_map.shape
    assert C == 1 and Cd == 1 and N == Nd
    assert Hd == Ho * r and Wd == Wo * r

    # Keep the native dtype through HBM; cast per-tile inside the kernel.
    out3 = outputs_density_map.reshape(N, Ho, Wo)
    den3 = density_map.reshape(N, Hd, Wd)
    # TODO(synk): for narrow maps a lane-dense (rows, k*128) flattening of the
    # inputs would avoid masked vld/vst; skipped to keep shapes fully general.

    # --- VMEM/bandwidth-aware batch-block size (padded (8,128) tile footprint). ---
    try:
        info = pltpu.get_tpu_info()
        vmem_cap = int(getattr(info, "vmem_capacity_bytes", 0)) or 64 * 1024 * 1024
    except Exception:  # pragma: no cover - conservative fallback
        vmem_cap = 64 * 1024 * 1024
    out_img_bytes = _round_up(Ho, 8) * _round_up(Wo, 128) * out3.dtype.itemsize
    den_img_bytes = _round_up(Hd, 8) * _round_up(Wd, 128) * den3.dtype.itemsize
    per_image_bytes = out_img_bytes + den_img_bytes

    target_step_bytes = 4 * 1024 * 1024           # ~HBM roofline by ~4 MiB/step, all gens
    vmem_budget = vmem_cap // 4                   # headroom for 2 double-buffered inputs
    bn = max(1, min(target_step_bytes // per_image_bytes,
                    vmem_budget // (2 * per_image_bytes)))
    bn = max(1, min(bn, pl.cdiv(N, 4)))           # keep >= 2 grid steps (megacore + pipelining)
    bn = int(min(bn, N, 256))
    g = pl.cdiv(N, bn)                            # ragged tail masked in-kernel, no padding copy

    flops_per_img = 3 * Ho * Wo
    if r > 1:
        flops_per_img += 2 * Ho * Hd * Wd + 2 * Ho * Wd * Wo
    cost = pl.CostEstimate(
        flops=int(N * flops_per_img),
        transcendentals=0,
        bytes_accessed=int(N * (Ho * Wo * out3.dtype.itemsize
                                + Hd * Wd * den3.dtype.itemsize) + g * 4),
    )

    vmem_needed = 2 * bn * per_image_bytes + (1 << 20)
    vmem_limit = int(min(vmem_cap // 2, max(2 * vmem_needed, 16 * 1024 * 1024)))

    partial = pl.pallas_call(
        _make_l2loss_kernel(bn, r, Ho, Wo, Hd, Wd, N),
        out_shape=jax.ShapeDtypeStruct((g, 1, 1), jnp.float32),
        grid_spec=pltpu.PrefetchScalarGridSpec(
            num_scalar_prefetch=0,
            grid=(g,),
            in_specs=[
                pl.BlockSpec((bn, Ho, Wo), lambda b: (b, 0, 0)),   # predictions
                pl.BlockSpec((bn, Hd, Wd), lambda b: (b, 0, 0)),   # gt density
            ],
            out_specs=pl.BlockSpec((1, 1, 1), lambda b: (b, 0, 0)),  # per-block partial sum
        ),
        compiler_params=pltpu.CompilerParams(
            dimension_semantics=("parallel",),     # no carried state -> parallel grid
            vmem_limit_bytes=vmem_limit,
        ),
        cost_estimate=cost,
    )(out3, den3)

    # mean reduction over all elements of `outputs`.
    loss = jnp.sum(partial) / jnp.float32(N * Ho * Wo)
    return loss, 0


def _reference(outputs_density_map, density_map, r):
    N, _, Ho, Wo = outputs_density_map.shape
    d = density_map.reshape(N, Ho, r, Wo, r).sum(axis=(2, 4))
    o = outputs_density_map.reshape(N, Ho, Wo)
    return jnp.mean((o - d) ** 2)


if __name__ == "__main__":
    key = jax.random.PRNGKey(0)
    k1, k2, k3 = jax.random.split(key, 3)

    # cfg.LOSS.downsample_ratio = 2 path
    downsample_ratio = 2
    N, Ho, Wo = 2, 8, 8            # predicted density map (already downsampled by the net)
    Hd, Wd = Ho * downsample_ratio, Wo * downsample_ratio
    outputs_dm = jax.random.uniform(k1, (N, 1, Ho, Wo), dtype=jnp.float32)
    density_map = jax.random.uniform(k2, (N, 1, Hd, Wd), dtype=jnp.float32)
    points = None  # unused by the module's forward

    loss, zero = l2_loss(outputs_dm, density_map, downsample_ratio)
    loss = jax.block_until_ready(loss)
    ref = _reference(outputs_dm, density_map, downsample_ratio)
    assert jnp.allclose(loss, ref, rtol=1e-5, atol=1e-5), (loss, ref)
    assert zero == 0

    # downsample_ratio == 1 path (pooling skipped)
    density_map1 = jax.random.uniform(k3, (N, 1, Ho, Wo), dtype=jnp.float32)
    loss1, zero1 = l2_loss(outputs_dm, density_map1, 1)
    loss1 = jax.block_until_ready(loss1)
    ref1 = _reference(outputs_dm, density_map1, 1)
    assert jnp.allclose(loss1, ref1, rtol=1e-5, atol=1e-5), (loss1, ref1)
    assert zero1 == 0

    print("KERNEL_OK")
</pallas_src>

<mosaic_0001>
module attributes {stable_mosaic.version = 11 : i64} {
  func.func @kernel(%arg0: i32, %arg1: memref<1x8x8xf32, #tpu.memory_space<vmem>>, %arg2: memref<1x16x16xf32, #tpu.memory_space<vmem>>, %arg3: memref<1x1x1xf32, #tpu.memory_space<vmem>>) attributes {dimension_semantics = [#tpu.dimension_semantics<parallel>], iteration_bounds = array<i64: 2>, scalar_prefetch = 0 : i64, scratch_operands = 0 : i64, tpu.core_type = #tpu.core_type<tc>, window_params = [{transform_indices = @transform_0, window_bounds = array<i64: 1, 8, 8>}, {transform_indices = @transform_1, window_bounds = array<i64: 1, 16, 16>}, {transform_indices = @transform_2, window_bounds = array<i64: 1, 1, 1>}]} {
    %0 = tpu.iota {dimensions = array<i32: 0>} : vector<8x16xi32>
    %1 = tpu.iota {dimensions = array<i32: 1>} : vector<8x16xi32>
    %c2_i32 = arith.constant 2 : i32
    %2 = vector.broadcast %c2_i32 : i32 to vector<8x16xi32>
    %3 = arith.muli %0, %2 : vector<8x16xi32>
    %4 = arith.cmpi sge, %1, %3 : vector<8x16xi32>
    %c1_i32 = arith.constant 1 : i32
    %5 = vector.broadcast %c1_i32 : i32 to vector<8x16xi32>
    %6 = arith.addi %0, %5 : vector<8x16xi32>
    %c2_i32_0 = arith.constant 2 : i32
    %7 = vector.broadcast %c2_i32_0 : i32 to vector<8x16xi32>
    %8 = arith.muli %6, %7 : vector<8x16xi32>
    %9 = arith.cmpi slt, %1, %8 : vector<8x16xi32>
    %10 = arith.andi %4, %9 : vector<8x16xi1>
    %11 = arith.extui %10 : vector<8x16xi1> to vector<8x16xi32>
    %12 = arith.sitofp %11 : vector<8x16xi32> to vector<8x16xf32>
    %13 = tpu.iota {dimensions = array<i32: 0>} : vector<16x8xi32>
    %14 = tpu.iota {dimensions = array<i32: 1>} : vector<16x8xi32>
    %c2_i32_1 = arith.constant 2 : i32
    %15 = vector.broadcast %c2_i32_1 : i32 to vector<16x8xi32>
    %16 = arith.muli %14, %15 : vector<16x8xi32>
    %17 = arith.cmpi sge, %13, %16 : vector<16x8xi32>
    %c1_i32_2 = arith.constant 1 : i32
    %18 = vector.broadcast %c1_i32_2 : i32 to vector<16x8xi32>
    %19 = arith.addi %14, %18 : vector<16x8xi32>
    %c2_i32_3 = arith.constant 2 : i32
    %20 = vector.broadcast %c2_i32_3 : i32 to vector<16x8xi32>
    %21 = arith.muli %19, %20 : vector<16x8xi32>
    %22 = arith.cmpi slt, %13, %21 : vector<16x8xi32>
    %23 = arith.andi %17, %22 : vector<16x8xi1>
    %24 = arith.extui %23 : vector<16x8xi1> to vector<16x8xi32>
    %25 = arith.sitofp %24 : vector<16x8xi32> to vector<16x8xf32>
    %cst = arith.constant 0.000000e+00 : f32
    %26 = vector.broadcast %cst : f32 to vector<8x8xf32>
    %c0 = arith.constant 0 : index
    %c0_4 = arith.constant 0 : index
    %c0_5 = arith.constant 0 : index
    %27 = vector.load %arg1[%c0, %c0_4, %c0_5] : memref<1x8x8xf32, #tpu.memory_space<vmem>>, vector<1x8x8xf32>
    %28 = vector.shape_cast %27 : vector<1x8x8xf32> to vector<8x8xf32>
    %c0_6 = arith.constant 0 : index
    %c0_7 = arith.constant 0 : index
    %c0_8 = arith.constant 0 : index
    %29 = vector.load %arg2[%c0_6, %c0_7, %c0_8] : memref<1x16x16xf32, #tpu.memory_space<vmem>>, vector<1x16x16xf32>
    %30 = vector.shape_cast %29 : vector<1x16x16xf32> to vector<16x16xf32>
    %cst_9 = arith.constant dense<0.000000e+00> : vector<8x16xf32>
    %31 = tpu.matmul %12, %30, %cst_9 {dimension_numbers = #tpu.dot_dimension_numbers<[1], [0], [0], [1], [0, 0, 1, 1], [], []>} : vector<8x16xf32>, vector<16x16xf32>, vector<8x16xf32> -> vector<8x16xf32>
    %cst_10 = arith.constant dense<0.000000e+00> : vector<8x8xf32>
    %32 = tpu.matmul %31, %25, %cst_10 {dimension_numbers = #tpu.dot_dimension_numbers<[1], [0], [0], [1], [0, 0, 1, 1], [], []>} : vector<8x16xf32>, vector<16x8xf32>, vector<8x8xf32> -> vector<8x8xf32>
    %33 = arith.subf %28, %32 : vector<8x8xf32>
    %34 = arith.mulf %33, %33 : vector<8x8xf32>
    %35 = arith.addf %26, %34 : vector<8x8xf32>
    %36 = vector.shape_cast %35 : vector<8x8xf32> to vector<1x8x8xf32>
    %cst_11 = arith.constant dense<0.000000e+00> : vector<1xf32>
    %37 = vector.multi_reduction <add>, %36, %cst_11 [1, 2] : vector<1x8x8xf32> to vector<1xf32>
    %38 = vector.shape_cast %37 : vector<1xf32> to vector<1x1x1xf32>
    %39 = vector.extract %38[0, 0, 0] : f32 from vector<1x1x1xf32>
    %40 = vector.broadcast %39 : f32 to vector<1x1x1xf32>
    %c0_12 = arith.constant 0 : index
    %c0_13 = arith.constant 0 : index
    %c0_14 = arith.constant 0 : index
    %41 = vector.load %arg3[%c0_12, %c0_13, %c0_14] : memref<1x1x1xf32, #tpu.memory_space<vmem>>, vector<1x1x1xf32>
    tpu.vector_store %arg3[%c0_12, %c0_13, %c0_14], %40 {strides = array<i32>} : memref<1x1x1xf32, #tpu.memory_space<vmem>>, vector<1x1x1xf32>,
    return
  }
  func.func @transform_0(%arg0: i32) -> (i32, i32, i32) {
    %c0_i32 = arith.constant 0 : i32
    %c0_i32_0 = arith.constant 0 : i32
    %c0_i32_1 = arith.constant 0 : i32
    return %arg0, %c0_i32, %c0_i32_0 : i32, i32, i32
  }
  func.func @transform_1(%arg0: i32) -> (i32, i32, i32) {
    %c0_i32 = arith.constant 0 : i32
    %c0_i32_0 = arith.constant 0 : i32
    %c0_i32_1 = arith.constant 0 : i32
    return %arg0, %c0_i32, %c0_i32_0 : i32, i32, i32
  }
  func.func @transform_2(%arg0: i32) -> (i32, i32, i32) {
    %c0_i32 = arith.constant 0 : i32
    %c0_i32_0 = arith.constant 0 : i32
    %c0_i32_1 = arith.constant 0 : i32
    return %arg0, %c0_i32, %c0_i32_0 : i32, i32, i32
  }
}

</mosaic_0001>

<bundles_post_ra>
// kernel: tpu_custom_call.1
= control target key start
LH: loop header
LB: loop body
LE: loop exit
PB: predicated region body
PF: predicated region fallthrough
CT: control target
= control target key end

     0   :  { %7 = vsyncpa [#allocation3], 0  ;;  %s853_s0 = inlined_call_operand.hbm [shape: f32[2,8,8], index: 0, kind: input, shape index: {}]   ;;  %s854_s1 = inlined_call_operand.hbm [shape: f32[2,16,16], index: 1, kind: input, shape index: {}]   ;;  %s855_s2 = inlined_call_operand.vmem [shape: f32[2,1,1], index: 2, kind: output, shape index: {}]  }
   0x1   :  { %9 = vsyncpa [#allocation3 + $0x1], 0 }
   0x2   :  { %10 = vsyncpa [#allocation5], 0 }
   0x3   :  { %12 = vsyncpa [#allocation5 + $0x1], 0  ;;  %s694_s9 = smov 0   ;;  %s696_s10 = smov 0  }
   0x4   :  { %s698_s11 = smov 0   ;;  %s700_s12 = smov 0  }
   0x5 LB: > { %s713_s13 = sadd.s32 4294967295, %s669_s12   ;;  %s716_s14 = sadd.s32 1, %s669_s12   ;;  %s669_s12 = sphi %s700_s12, %s866_s12   ;;  %s665_s11 = sphi %s698_s11, %s865_s11   ;;  %s661_s10 = sphi %s696_s10, %s864_s10   ;;  %s657_s9 = sphi %s694_s9, %s863_s9  }
   0x6   : > { %s22_s15 = ssub.s32 %s669_s12, %s716_s14  ;;  %s25_s16 = sadd.s32 1, %s665_s11 }
   0x7   : > { %p23_p0 = scmp.eq.s32.totalorder %s22_s15, 0  ;;  %p32_p1 = scmp.ne.s32.totalorder %s665_s11, %s661_s10 }
   0x8   : > { %p33_p2 = scmp.eq.s32.totalorder %s669_s12, 0  ;;  %p38_p3 = scmp.ne.s32.totalorder %s661_s10, %s657_s9 }
   0x9   : > { %s726_s17 = scalar_select %p23_p0, %s665_s11, %s25_s16  }
   0xa   : > { %p34_p4 = por %p33_p2, %p32_p1  ;;  %p39_p5 = scmp.eq.s32.totalorder %s713_s13, 0 }
   0xb   : > { %p532_p6 = scmp.lt.s32.totalorder %s669_s12, 2  ;;  %s735_s19 = sand.u32 1, %s665_s11  }
   0xc   : > { %p730_p7 = por %p39_p5, %p38_p3  ;;  %s475_s20 = sshll.u32 %s735_s19, 3 }
   0xd   : > { %s476_s21 = sshll.u32 %s669_s12, 7  ;;  %s118_s25 = scalar_lea.vmem [#allocation2], %s475_s20 }
   0xe   : > { %s857_s18 = scalar_select %p730_p7, 1, 0 }
   0xf   : > { %s742_s24 = scalar_lea.hbm %s853_s0, %s476_s21  ;;  %s125_s26 = sshll.u32 %s118_s25, 4  ;;  %s744_s26 = int_to_ptr.vmem [resolvable:$true] %s125_s26 }
  0x10   : > { %p746_p8 = pnand %p532_p6, %p34_p4  ;;  %s115_s28 = scalar_lea.sflag [#allocation3], %s735_s19 }
  0x11   : > { %s571_s29 = scalar_lea.hbm %s742_s24, 128  ;;  %s576_s4 = scalar_lea.hbm %s853_s0, 256 }
  0x12   : > { %p572_p11 = scmp.ne.s32.totalorder %s742_s24, %s571_s29  ;;  %p573_p12 = pneg %p746_p8 }
  0x13   : > { %p577_p1 = scmp.lt.u32.totalorder %s742_s24, %s853_s0  ;;  %p578_p2 = scmp.lt.u32.totalorder %s576_s4, %s571_s29 }
  0x14   : > { %p574_p13 = pnand %p573_p12, %p572_p11  ;;  %p580_p4 = scmp.lt.u32.totalorder %s571_s29, %s742_s24 }
  0x15   : > { %p579_p3 = por %p578_p2, %p577_p1 }
  0x16   : > { %p575_p0 = pneg %p574_p13 }
  0x17   : > { %p581_p5 = por %p580_p4, %p579_p3 }
  0x19   : > { %p582_p6 = pnand %p581_p5, %p575_p0 }
  0x1b   : > { %585 = shalt.err (!%p582_p6)
}
  0x1c   : > { %s586_s7 = scalar_lea.vmem %s744_s26, 128  ;;  %s671_s8 = smov [#allocation2]  }
  0x1d   : > { %p587_p11 = scmp.ne.s32.totalorder %s744_s26, %s586_s7  ;;  %s591_s9 = sshll.u32 %s671_s8, 4  ;;  %s592_s9 = int_to_ptr.vmem [resolvable:$false] %s591_s9 }
  0x1e   : > { %s593_s15 = scalar_lea.vmem %s592_s9, 256  ;;  %p594_p10 = scmp.lt.s32.totalorder %s744_s26, %s592_s9 }
  0x1f   : > { %p589_p13 = pnand %p587_p11, %p573_p12  ;;  %p595_p1 = scmp.lt.s32.totalorder %s593_s15, %s586_s7 }
  0x21   : > { %p590_p9 = pneg %p589_p13  ;;  %p596_p2 = por %p595_p1, %p594_p10 }
  0x23   : > { %p597_p3 = pnand %p596_p2, %p590_p9 }
  0x25   : > { %600 = shalt.err (!%p597_p3)
}
  0x26   : > { %528 = dma.hbm_to_vmem [thread:$0]  (!%p746_p8), %s742_s24, 128, %s744_s26, %s115_s28  }
  0x27   : > { %p859_p0 = scmp.lt.s32.totalorder %s669_s12, 3  ;;  %p860_p4 = scmp.ge.s32.totalorder %s669_s12, 1 }
  0x28   : > { %s477_s20 = sshll.u32 %s735_s19, 4  ;;  %s492_s21 = sshll.u32 %s669_s12, 8 }
  0x29   : > { %p782_p5 = pnand %p860_p4, %p859_p0  ;;  %s791_s25 = scalar_lea.hbm %s854_s1, %s492_s21 }
  0x2a   : > { %s136_s29 = scalar_lea.vmem [#allocation4], %s477_s20  ;;  %s133_s24 = scalar_lea.sflag [#allocation5], %s735_s19 }
  0x2b   : > { %s143_s30 = sshll.u32 %s136_s29, 4  ;;  %s601_s26 = scalar_lea.hbm %s791_s25, 256  ;;  %s793_s30 = int_to_ptr.vmem [resolvable:$true] %s143_s30 }
  0x2c   : > { %p602_p9 = scmp.ne.s32.totalorder %s791_s25, %s601_s26  ;;  %s606_s3 = scalar_lea.hbm %s854_s1, 512 }
  0x2d   : > { %p607_p11 = scmp.lt.u32.totalorder %s791_s25, %s854_s1  ;;  %p608_p13 = scmp.lt.u32.totalorder %s606_s3, %s601_s26 }
  0x2e   : > { %p604_p10 = pnand %p602_p9, %p573_p12  ;;  %p610_p2 = scmp.lt.u32.totalorder %s601_s26, %s791_s25 }
  0x2f   : > { %p609_p1 = por %p608_p13, %p607_p11 }
  0x30   : > { %p605_p6 = pneg %p604_p10 }
  0x31   : > { %p611_p3 = por %p610_p2, %p609_p1 }
  0x33   : > { %p612_p0 = pnand %p611_p3, %p605_p6 }
  0x35   : > { %615 = shalt.err (!%p612_p0)
}
  0x36   : > { %s616_s6 = scalar_lea.vmem %s793_s30, 256  ;;  %s672_s7 = smov [#allocation4]  }
  0x37   : > { %p617_p4 = scmp.ne.s32.totalorder %s793_s30, %s616_s6  ;;  %s621_s8 = sshll.u32 %s672_s7, 4  ;;  %s622_s8 = int_to_ptr.vmem [resolvable:$false] %s621_s8 }
  0x38   : > { %s623_s9 = scalar_lea.vmem %s622_s8, 512  ;;  %p624_p7 = scmp.lt.s32.totalorder %s793_s30, %s622_s8 }
  0x39   : > { %p619_p9 = pnand %p617_p4, %p573_p12  ;;  %p625_p11 = scmp.lt.s32.totalorder %s623_s9, %s616_s6 }
  0x3b   : > { %p620_p10 = pneg %p619_p9  ;;  %p626_p13 = por %p625_p11, %p624_p7 }
  0x3d   : > { %p627_p1 = pnand %p626_p13, %p620_p10 }
  0x3f   : > { %630 = shalt.err (!%p627_p1)
}
  0x40   : > { %s673_s15 = smov 128   ;;  %s674_s20 = smov 8  }
  0x41   : > { %531 = dma.hbm_to_vmem [thread:$0]  (!%p746_p8), %s791_s25, 256, %s793_s30, %s133_s24, %s673_s15, %s673_s15, %s674_s20  }
  0x42   : > { %155 = sbr.rel (%p782_p5) target bundleno = 723 (0x2d3), region = 28  ;;  %s157_s21 = sand.u32 (!%p782_p5), 1, %s661_s10  }
  0x43   : > { %s481_s22 = sshll.u32 (!%p782_p5), %s157_s21, 3  ;;  %s158_s23 = scalar_lea.sflag (!%p782_p5), [#allocation3], %s157_s21 }
  0x44   : > { %s824_s29 = scalar_lea.vmem (!%p782_p5), [#allocation2], %s481_s22  ;;  %p862_p7 = scmp.ne.s32.totalorder (!%p782_p5), %s857_s18, 0 }
  0x49   : > { %648 = dma.done.wait (%p862_p7), %s158_s23, 128  }
  0x4a   : > { %650 = vsyncadd (%p862_p7), %s158_s23, 4294967168  ;;  %s482_s26 = sshll.u32 %s157_s21, 4  ;;  %s167_s27 = scalar_lea.sflag [#allocation5], %s157_s21 }
  0x4b   : > { %s170_s19 = scalar_lea.vmem [#allocation4], %s482_s26 }
  0x4c   : > { %652 = dma.done.wait (%p862_p7), %s167_s27, 256  }
  0x4d   : > { %654 = vsyncadd (%p862_p7), %s167_s27, 4294967040  ;;  %v197_v0 = vlaneseq  ;;  %v675_v1 = vmov 0.0|0.0   ;;  %vm676_vm0 = vmmov 0   ;;  %v677_v2 = vmov 0.0   ;;  %v224_v11 = vld [vmem:[%s170_s19] sm:$0xff]  ;;  %v225_v12 = vld [vmem:[%s170_s19 + $0x8] sm:$0xff] }
  0x4e   : > { %513 = vmatprep.subr.bf16.mxu0 %v675_v1  ;;  %503 = vmatprep.mubr.msk.f32.mxu0 %vm676_vm0, %v677_v2  ;;  %v514_v14 = vpack.c.bf16 %v225_v12, %v224_v11  ;;  %vm226_vm8 = vcmask 130048   ;;  %v678_v16 = vmov 1.0|1.0   ;;  %v223_v19 = vld [vmem:[%s824_s29] sm:$0xff]  ;;  %vm376_vm12 = vcmask 64512   ;;  %p194_p8 = scmp.lt.s32.totalorder %s713_s13, 1 }
  0x4f   : > { %v198_v3 = vshrl.u32 %v197_v0, 7  ;;  %v200_v4 = vand.u32 127, %v197_v0  ;;  %516 = vmatprep.subr.bf16.mxu1 %v675_v1  ;;  %510 = vmatprep.mubr.msk.f32.mxu1 %vm676_vm0, %v677_v2  ;;  %vm388_vm13 = vcmask 0  }
  0x50   : > { %515 = vmatpush3.bf16.msra.mxu0 %v514_v14  ;;  %s868_s13 = smov (!%p194_p8, %s713_s13), 1 }
  0x51   : > { %v201_v5 = vmul.u32 2, %v198_v3  ;;  %v203_v6 = vadd.s32 1, %v198_v3  ;;  %v209_v7 = vadd.s32 8, %v198_v3  ;;  %v210_v8 = vmul.u32 2, %v200_v4  ;;  %s196_s25 = scalar_lea.vmem %s855_s2, %s868_s13 }
  0x52   : > { %v213_v9 = vadd.s32 1, %v200_v4 }
  0x53   : > { %vm202_vm1 = vcmp.ge.s32.totalorder %v200_v4, %v201_v5  ;;  %v204_v10 = vmul.u32 2, %v203_v6  ;;  %vm211_vm2 = vcmp.ge.s32.totalorder %v198_v3, %v210_v8  ;;  %vm212_vm4 = vcmp.ge.s32.totalorder %v209_v7, %v210_v8 }
  0x54   : > { %v214_v13 = vmul.u32 2, %v213_v9 }
  0x55   : > { %vm205_vm3 = vcmp.lt.s32.totalorder %v200_v4, %v204_v10 }
  0x56   : > { %vm206_vm5 = vmand %vm202_vm1, %vm205_vm3  ;;  %vm215_vm6 = vcmp.lt.s32.totalorder %v198_v3, %v214_v13  ;;  %vm216_vm7 = vcmp.lt.s32.totalorder %v209_v7, %v214_v13 }
  0x57   : > { %v483_v15 = vsel %vm206_vm5, 1.0, %v677_v2  ;;  %vm217_vm9 = vmand %vm211_vm2, %vm215_vm6 }
  0x58   : > { %vm218_vm10 = vmand %vm212_vm4, %vm216_vm7  ;;  %504 = vmatmul.mubr.msk.f32.vlgmr.msra.gmra.mrb[0].mxu0 %vm226_vm8, %v483_v15 }
  0x59   : > { %vm517_vm11 = vmpackc.low %vm218_vm10, %vm217_vm9 }
  0x5a   : > { %518 = vmatpush3.bf16.msk.msra.mxu1 %vm517_vm11, %v678_v16 }
 0x12b   : > { %v296_v17 = vpop.f32.mrb[0].mxu0 }
 0x12c   : > { %v505_v18 = vpop.f32.mrb[1].mxu0  ;;  %511 = vmatmul.mubr.msk.f32.vlgmr.msra.gmra.mrb[0].mxu1 %vm226_vm8, %v296_v17 }
 0x1ff   : > { %v369_v20 = vpop.f32.mrb[0].mxu1 }
 0x200   : > { %v373_v21 = vsub.f32 %v223_v19, %v369_v20  ;;  %v512_v22 = vpop.f32.mrb[1].mxu1 }
 0x202   : > { %v374_v23 = vmul.f32 %v373_v21, %v373_v21 }
 0x204   : > { %v377_v24 = vsel %vm376_vm12, %v374_v23, 0.0 }
 0x205   : > { %378 = vadd.xlane.f32.xlu0 %v377_v24 }
 0x292   : > { %v379_v25 = vpop.xlane.xlu0 %378 }
 0x293   : > { %v380_v26 = vrot.slane %v379_v25, 4 }
 0x295   : > { %v381_v27 = vadd.f32 %v380_v26, %v379_v25 }
 0x297   : > { %v382_v28 = vrot.slane %v381_v27, 2 }
 0x299   : > { %v383_v29 = vadd.f32 %v382_v28, %v381_v27 }
 0x29b   : > { %v384_v30 = vrot.slane %v383_v29, 1 }
 0x29d   : > { %v385_v31 = vadd.f32 %v384_v30, %v383_v29 }
 0x29f   : > { %519 = vpush %v385_v31 }
 0x2d0   : > { %s520_s30 = spop %519 }
 0x2d1   : > { %v387_v32 = vstv %s520_s30 }
 0x2d2   : > { %389 = vst.msk [vmem:[%s196_s25] sm:$0x1] %vm388_vm13, %v387_v32 }
 0x2d3 PF: > { %p15_p12 = scmp.ge.s32.totalorder %s716_s14, 4   ;;  %s863_s9 = smov %s661_s10 }
 0x2d4   : > { %s864_s10 = smov %s665_s11  ;;  %s865_s11 = smov %s726_s17 }
 0x2d5   : > { %s866_s12 = smov %s716_s14  ;;  %17 = sbr.rel (!%p15_p12) target bundleno = 5 (0x5), region = 81 }
 0x2dc   :  { %407 = vsyncpa [#allocation3], 1 }
 0x2dd   :  { %409 = vsyncpa [#allocation3 + $0x1], 1 }
 0x2de   :  { %410 = vsyncpa [#allocation5], 1 }
 0x2df   :  { %412 = vsyncpa [#allocation5 + $0x1], 1 }

</bundles_post_ra>
